<compile_context>
chip_gen: v6e
topology: v6e:2x2x1
jax: 0.10.0
libtpu: 0.0.40
codegen_flags: <defaults>
</compile_context>

<pallas_src>
import math

import jax
import jax.numpy as jnp
from jax.experimental import pallas as pl
from jax.experimental.pallas import tpu as pltpu


def _mha_first_token_kernel(x_ref, wqkv_ref, wo_ref, hmat_ref,
                            bqkv_ref, bo_ref, o_ref):
    """One grid step == one tile of Bt batch elements.

    x_ref    : (Bt, S, E)   compute dtype (bf16 or f32)
    wqkv_ref : (E, 3E)      [scaled Wq^T | Wk^T | Wv^T], compute dtype
    wo_ref   : (E, E)       Wo^T, compute dtype
    hmat_ref : (E, E)       0/1 block-diagonal "same head" matrix, compute dtype
    bqkv_ref : (1, 3E) f32 ; bo_ref : (1, E) f32
    o_ref    : (Bt, E) f32  attention output at query position 0
    """
    Bt, S, E = x_ref.shape
    cd = x_ref.dtype

    x2 = x_ref[...].reshape(Bt * S, E)                         # (Bt*S, E)

    # Fused Q/K/V in-projection: one MXU pass, f32 accumulation, f32 bias.
    qkv = jnp.dot(x2, wqkv_ref[...],
                  preferred_element_type=jnp.float32) + bqkv_ref[...]
    q0 = qkv[:, :E].reshape(Bt, S, E)[:, 0, :]                 # (Bt, E) query 0 only
    k3 = qkv[:, E:2 * E].reshape(Bt, S, E)                     # (Bt, S, E)
    v3 = qkv[:, 2 * E:].reshape(Bt, S, E)                      # (Bt, S, E)

    # Per-head scores replicated across each head's lane block (scale already
    # folded into Wq): s[b,t,e] = sum_{e' in head(e)} q0[b,e'] * k[b,t,e'].
    prod = (q0[:, None, :] * k3).astype(cd)                    # (Bt, S, E)
    s = jnp.dot(prod.reshape(Bt * S, E), hmat_ref[...],
                preferred_element_type=jnp.float32).reshape(Bt, S, E)

    # Softmax over keys (axis=1); values identical within a head's lane block,
    # so this is exactly the per-head softmax. Reciprocal goes to the EUP.
    m = jnp.max(s, axis=1, keepdims=True)                      # (Bt, 1, E)
    p = jnp.exp(s - m)
    denom = jnp.sum(p, axis=1, keepdims=True)
    p = p * pl.reciprocal(denom, approx=True)

    # Context for query 0 and output projection.
    ctx = jnp.sum(p * v3, axis=1).astype(cd)                   # (Bt, E)
    out = jnp.dot(ctx, wo_ref[...],
                  preferred_element_type=jnp.float32) + bo_ref[...]
    o_ref[...] = out.astype(o_ref.dtype)


def prepare_params(params, *, num_heads, compute_dtype=jnp.bfloat16):
    """One-time parameter prep (hoisted out of the per-call path).

    Folds the 1/sqrt(head_dim) attention scale into the Q projection, fuses
    Q/K/V weights and biases, pre-transposes, builds the 0/1 block-diagonal
    head-sum matrix and casts matmul operands to the compute dtype.
    """
    E = params["wq"].shape[0]
    assert E % num_heads == 0
    hd = E // num_heads
    scale = 1.0 / math.sqrt(hd)
    cd = jnp.dtype(compute_dtype)

    wq_s = params["wq"] * scale
    bq_s = params["bq"] * scale
    wqkv_t = jnp.concatenate([wq_s.T, params["wk"].T, params["wv"].T], axis=1)
    bqkv = jnp.concatenate([bq_s, params["bk"], params["bv"]]).reshape(1, 3 * E)

    head_ids = jnp.arange(E, dtype=jnp.int32) // hd
    hmat = (head_ids[:, None] == head_ids[None, :])            # exact 0/1

    return {
        "wqkv_t": wqkv_t.astype(cd),                           # (E, 3E)
        "wo_t": params["wo"].T.astype(cd),                     # (E, E)
        "hmat": hmat.astype(cd),                               # (E, E)
        "bqkv": bqkv.astype(jnp.float32),                      # (1, 3E)
        "bo": params["bo"].reshape(1, E).astype(jnp.float32),  # (1, E)
        "num_heads": num_heads,
        "embed_dim": E,
    }


def _default_batch_tile(B, S, E, itemsize):
    """Bytes-based batch tile: ~1 MiB of x per grid step, VMEM-capped."""
    target_x_bytes = 1 << 20                    # amortize ~0.35us per-step overhead
    bt = target_x_bytes // max(1, S * E * itemsize)
    # Keep f32 intermediates (qkv/scores/softmax ~16 B per x element) plus the
    # double-buffered x/out tiles comfortably inside the 32 MiB scoped budget.
    vmem_cap_bytes = 20 << 20
    bt = min(bt, vmem_cap_bytes // max(1, S * E * 16))
    bt = min(bt, max(8, -(-B // 8) * 8))
    return max(8, (bt // 8) * 8)


def user_clicks_encoder(x, prepped, *, batch_tile=None):
    """x: (B, S, E) float array. Returns (B, 1, E) == MHA(X, X, X)[:, [0], :]."""
    B, S, E = x.shape
    assert E == prepped["embed_dim"]
    cd = prepped["wqkv_t"].dtype
    x = x.astype(cd)                            # bf16 x tile -> half the HBM DMA

    Bt = batch_tile if batch_tile is not None else _default_batch_tile(
        B, S, E, cd.itemsize)
    Bt = max(8, min((Bt // 8) * 8, max(8, -(-B // 8) * 8)))
    # v7x has 2 TensorCores: keep >= 2 steps on the "parallel" axis when B allows.
    if pl.cdiv(B, Bt) < 2 and B > 8:
        Bt = max(8, ((-(-B // 2)) + 7) // 8 * 8)

    B_pad = pl.cdiv(B, Bt) * Bt
    if B_pad != B:
        x = jnp.pad(x, ((0, B_pad - B), (0, 0), (0, 0)))

    const = lambda b: (0, 0)

    out2d = pl.pallas_call(
        _mha_first_token_kernel,
        out_shape=jax.ShapeDtypeStruct((B_pad, E), jnp.float32),
        grid_spec=pltpu.PrefetchScalarGridSpec(
            num_scalar_prefetch=0,
            grid=(B_pad // Bt,),
            in_specs=[
                pl.BlockSpec((Bt, S, E), lambda b: (b, 0, 0)),   # X tile
                pl.BlockSpec((E, 3 * E), const),                 # [sWq^T|Wk^T|Wv^T]
                pl.BlockSpec((E, E), const),                     # Wo^T
                pl.BlockSpec((E, E), const),                     # head-sum matrix
                pl.BlockSpec((1, 3 * E), const),                 # [s*bq|bk|bv]
                pl.BlockSpec((1, E), const),                     # bo
            ],
            out_specs=pl.BlockSpec((Bt, E), lambda b: (b, 0)),
        ),
        compiler_params=pltpu.CompilerParams(
            dimension_semantics=("parallel",),
            vmem_limit_bytes=32 * 1024 * 1024),
    )(x, prepped["wqkv_t"], prepped["wo_t"], prepped["hmat"],
      prepped["bqkv"], prepped["bo"])

    # Module semantics: H[:, [0], :] keeps the singleton token dim.
    return out2d[:B].reshape(B, 1, E)


def _reference(x, params, *, num_heads):
    """Pure-JAX nn.MultiheadAttention(batch_first=True) forward, first token."""
    B, S, E = x.shape
    hd = E // num_heads
    q = x @ params["wq"].T + params["bq"]
    k = x @ params["wk"].T + params["bk"]
    v = x @ params["wv"].T + params["bv"]

    def split(t):
        return t.reshape(B, S, num_heads, hd).transpose(0, 2, 1, 3)  # (B,H,S,hd)

    q, k, v = split(q), split(k), split(v)
    s = jnp.einsum("bhqd,bhkd->bhqk", q, k) / math.sqrt(hd)
    p = jax.nn.softmax(s, axis=-1)
    ctx = jnp.einsum("bhqk,bhkd->bhqd", p, v).transpose(0, 2, 1, 3).reshape(B, S, E)
    out = ctx @ params["wo"].T + params["bo"]
    return out[:, 0:1, :]


def init_params(key, embed_dim):
    """Deterministic synthetic weights matching nn.MultiheadAttention shapes."""
    ks = jax.random.split(key, 6)
    bound = math.sqrt(6.0 / (embed_dim + 3 * embed_dim))   # xavier-ish for (3E, E)
    in_proj = jax.random.uniform(ks[0], (3 * embed_dim, embed_dim),
                                 minval=-bound, maxval=bound, dtype=jnp.float32)
    wq, wk, wv = jnp.split(in_proj, 3, axis=0)
    wo_bound = 1.0 / math.sqrt(embed_dim)
    wo = jax.random.uniform(ks[1], (embed_dim, embed_dim),
                            minval=-wo_bound, maxval=wo_bound, dtype=jnp.float32)

    def b(k):
        return jax.random.uniform(k, (embed_dim,), minval=-0.1, maxval=0.1,
                                  dtype=jnp.float32)

    return {"wq": wq, "wk": wk, "wv": wv, "wo": wo,
            "bq": b(ks[2]), "bk": b(ks[3]), "bv": b(ks[4]), "bo": b(ks[5])}


if __name__ == "__main__":
    B, S = 2, 8
    news_vec_dim = 32   # carried by the module but unused in forward()
    user_vec_dim = 32   # embed_dim of the self-attention
    num_heads = 4

    key = jax.random.PRNGKey(0)
    kx, kp = jax.random.split(key)
    x = jax.random.normal(kx, (B, S, user_vec_dim), dtype=jnp.float32)
    params = init_params(kp, user_vec_dim)
    ref = _reference(x, params, num_heads=num_heads)

    # Default (performance) path: bf16 matmul operands / bf16 x DMA.
    prepped_bf16 = prepare_params(params, num_heads=num_heads,
                                  compute_dtype=jnp.bfloat16)
    out = user_clicks_encoder(x, prepped_bf16)
    jax.block_until_ready(out)
    assert out.shape == (B, 1, user_vec_dim)
    err_bf16 = float(jnp.max(jnp.abs(out - ref)))
    assert jnp.allclose(out, ref, rtol=3e-2, atol=3e-2), (
        "bf16 path max abs err = %f" % err_bf16)

    # f32-operand path: exactness check of the kernel algorithm.
    prepped_f32 = prepare_params(params, num_heads=num_heads,
                                 compute_dtype=jnp.float32)
    out_f32 = user_clicks_encoder(x, prepped_f32)
    jax.block_until_ready(out_f32)
    err_f32 = float(jnp.max(jnp.abs(out_f32 - ref)))
    assert jnp.allclose(out_f32, ref, rtol=5e-3, atol=5e-3), (
        "f32 path max abs err = %f" % err_f32)

    print("KERNEL_OK")
</pallas_src>

<mosaic_0001>
module attributes {stable_mosaic.version = 11 : i64} {
  func.func @_mha_first_token_kernel(%arg0: i32, %arg1: memref<8x8x32xbf16, #tpu.memory_space<vmem>>, %arg2: memref<32x96xbf16, #tpu.memory_space<vmem>>, %arg3: memref<32x32xbf16, #tpu.memory_space<vmem>>, %arg4: memref<32x32xbf16, #tpu.memory_space<vmem>>, %arg5: memref<1x96xf32, #tpu.memory_space<vmem>>, %arg6: memref<1x32xf32, #tpu.memory_space<vmem>>, %arg7: memref<8x32xf32, #tpu.memory_space<vmem>>) attributes {dimension_semantics = [#tpu.dimension_semantics<parallel>], iteration_bounds = array<i64: 1>, scalar_prefetch = 0 : i64, scratch_operands = 0 : i64, tpu.core_type = #tpu.core_type<tc>, window_params = [{transform_indices = @transform_0, window_bounds = array<i64: 8, 8, 32>}, {pipeline_mode = #tpu.pipeline_mode<synchronous>, transform_indices = @transform_1, window_bounds = array<i64: 32, 96>}, {pipeline_mode = #tpu.pipeline_mode<synchronous>, transform_indices = @transform_2, window_bounds = array<i64: 32, 32>}, {pipeline_mode = #tpu.pipeline_mode<synchronous>, transform_indices = @transform_3, window_bounds = array<i64: 32, 32>}, {pipeline_mode = #tpu.pipeline_mode<synchronous>, transform_indices = @transform_4, window_bounds = array<i64: 1, 96>}, {pipeline_mode = #tpu.pipeline_mode<synchronous>, transform_indices = @transform_5, window_bounds = array<i64: 1, 32>}, {transform_indices = @transform_6, window_bounds = array<i64: 8, 32>}]} {
    %c0 = arith.constant 0 : index
    %c0_0 = arith.constant 0 : index
    %c0_1 = arith.constant 0 : index
    %0 = vector.load %arg1[%c0, %c0_0, %c0_1] : memref<8x8x32xbf16, #tpu.memory_space<vmem>>, vector<8x8x32xbf16>
    %1 = vector.shape_cast %0 : vector<8x8x32xbf16> to vector<64x32xbf16>
    %c0_2 = arith.constant 0 : index
    %c0_3 = arith.constant 0 : index
    %2 = vector.load %arg2[%c0_2, %c0_3] : memref<32x96xbf16, #tpu.memory_space<vmem>>, vector<32x96xbf16>
    %cst = arith.constant dense<0.000000e+00> : vector<64x96xf32>
    %3 = tpu.matmul %1, %2, %cst {dimension_numbers = #tpu.dot_dimension_numbers<[1], [0], [0], [1], [0, 0, 1, 1], [], []>} : vector<64x32xbf16>, vector<32x96xbf16>, vector<64x96xf32> -> vector<64x96xf32>
    %c0_4 = arith.constant 0 : index
    %c0_5 = arith.constant 0 : index
    %4 = vector.load %arg5[%c0_4, %c0_5] : memref<1x96xf32, #tpu.memory_space<vmem>>, vector<1x96xf32>
    %5 = vector.broadcast %4 : vector<1x96xf32> to vector<64x96xf32>
    %6 = arith.addf %3, %5 : vector<64x96xf32>
    %7 = vector.extract_strided_slice %6 {offsets = [0, 0], sizes = [64, 32], strides = [1, 1]} : vector<64x96xf32> to vector<64x32xf32>
    %8 = vector.shape_cast %7 : vector<64x32xf32> to vector<8x8x32xf32>
    %9 = vector.extract_strided_slice %8 {offsets = [0, 0, 0], sizes = [8, 1, 32], strides = [1, 1, 1]} : vector<8x8x32xf32> to vector<8x1x32xf32>
    %10 = vector.shape_cast %9 : vector<8x1x32xf32> to vector<8x32xf32>
    %11 = vector.extract_strided_slice %6 {offsets = [0, 32], sizes = [64, 32], strides = [1, 1]} : vector<64x96xf32> to vector<64x32xf32>
    %12 = vector.shape_cast %11 : vector<64x32xf32> to vector<8x8x32xf32>
    %13 = vector.extract_strided_slice %6 {offsets = [0, 64], sizes = [64, 32], strides = [1, 1]} : vector<64x96xf32> to vector<64x32xf32>
    %14 = vector.shape_cast %13 : vector<64x32xf32> to vector<8x8x32xf32>
    %15 = vector.shape_cast %10 : vector<8x32xf32> to vector<8x1x32xf32>
    %16 = vector.broadcast %15 : vector<8x1x32xf32> to vector<8x8x32xf32>
    %17 = arith.mulf %16, %12 : vector<8x8x32xf32>
    %18 = arith.truncf %17 : vector<8x8x32xf32> to vector<8x8x32xbf16>
    %19 = vector.shape_cast %18 : vector<8x8x32xbf16> to vector<64x32xbf16>
    %c0_6 = arith.constant 0 : index
    %c0_7 = arith.constant 0 : index
    %20 = vector.load %arg4[%c0_6, %c0_7] : memref<32x32xbf16, #tpu.memory_space<vmem>>, vector<32x32xbf16>
    %cst_8 = arith.constant dense<0.000000e+00> : vector<64x32xf32>
    %21 = tpu.matmul %19, %20, %cst_8 {dimension_numbers = #tpu.dot_dimension_numbers<[1], [0], [0], [1], [0, 0, 1, 1], [], []>} : vector<64x32xbf16>, vector<32x32xbf16>, vector<64x32xf32> -> vector<64x32xf32>
    %22 = vector.shape_cast %21 : vector<64x32xf32> to vector<8x8x32xf32>
    %cst_9 = arith.constant dense<0xFF800000> : vector<8x32xf32>
    %23 = vector.multi_reduction <maximumf>, %22, %cst_9 [1] : vector<8x8x32xf32> to vector<8x32xf32>
    %24 = vector.shape_cast %23 : vector<8x32xf32> to vector<8x1x32xf32>
    %25 = vector.broadcast %24 : vector<8x1x32xf32> to vector<8x8x32xf32>
    %26 = arith.subf %22, %25 : vector<8x8x32xf32>
    %27 = math.exp %26 : vector<8x8x32xf32>
    %cst_10 = arith.constant dense<0.000000e+00> : vector<8x32xf32>
    %28 = vector.multi_reduction <add>, %27, %cst_10 [1] : vector<8x8x32xf32> to vector<8x32xf32>
    %29 = vector.shape_cast %28 : vector<8x32xf32> to vector<8x1x32xf32>
    %30 = tpu.reciprocal %29 {approx = true} : vector<8x1x32xf32> -> vector<8x1x32xf32>
    %31 = vector.broadcast %30 : vector<8x1x32xf32> to vector<8x8x32xf32>
    %32 = arith.mulf %27, %31 : vector<8x8x32xf32>
    %33 = arith.mulf %32, %14 : vector<8x8x32xf32>
    %cst_11 = arith.constant dense<0.000000e+00> : vector<8x32xf32>
    %34 = vector.multi_reduction <add>, %33, %cst_11 [1] : vector<8x8x32xf32> to vector<8x32xf32>
    %35 = arith.truncf %34 : vector<8x32xf32> to vector<8x32xbf16>
    %c0_12 = arith.constant 0 : index
    %c0_13 = arith.constant 0 : index
    %36 = vector.load %arg3[%c0_12, %c0_13] : memref<32x32xbf16, #tpu.memory_space<vmem>>, vector<32x32xbf16>
    %cst_14 = arith.constant dense<0.000000e+00> : vector<8x32xf32>
    %37 = tpu.matmul %35, %36, %cst_14 {dimension_numbers = #tpu.dot_dimension_numbers<[1], [0], [0], [1], [0, 0, 1, 1], [], []>} : vector<8x32xbf16>, vector<32x32xbf16>, vector<8x32xf32> -> vector<8x32xf32>
    %c0_15 = arith.constant 0 : index
    %c0_16 = arith.constant 0 : index
    %38 = vector.load %arg6[%c0_15, %c0_16] : memref<1x32xf32, #tpu.memory_space<vmem>>, vector<1x32xf32>
    %39 = vector.broadcast %38 : vector<1x32xf32> to vector<8x32xf32>
    %40 = arith.addf %37, %39 : vector<8x32xf32>
    %c0_17 = arith.constant 0 : index
    %c0_18 = arith.constant 0 : index
    %41 = vector.load %arg7[%c0_17, %c0_18] : memref<8x32xf32, #tpu.memory_space<vmem>>, vector<8x32xf32>
    tpu.vector_store %arg7[%c0_17, %c0_18], %40 {strides = array<i32>} : memref<8x32xf32, #tpu.memory_space<vmem>>, vector<8x32xf32>,
    return
  }
  func.func @transform_0(%arg0: i32) -> (i32, i32, i32) {
    %c0_i32 = arith.constant 0 : i32
    %c0_i32_0 = arith.constant 0 : i32
    %c0_i32_1 = arith.constant 0 : i32
    return %arg0, %c0_i32, %c0_i32_0 : i32, i32, i32
  }
  func.func @transform_1(%arg0: i32) -> (i32, i32) {
    %c0_i32 = arith.constant 0 : i32
    %c0_i32_0 = arith.constant 0 : i32
    %c0_i32_1 = arith.constant 0 : i32
    return %c0_i32, %c0_i32_0 : i32, i32
  }
  func.func @transform_2(%arg0: i32) -> (i32, i32) {
    %c0_i32 = arith.constant 0 : i32
    %c0_i32_0 = arith.constant 0 : i32
    %c0_i32_1 = arith.constant 0 : i32
    return %c0_i32, %c0_i32_0 : i32, i32
  }
  func.func @transform_3(%arg0: i32) -> (i32, i32) {
    %c0_i32 = arith.constant 0 : i32
    %c0_i32_0 = arith.constant 0 : i32
    %c0_i32_1 = arith.constant 0 : i32
    return %c0_i32, %c0_i32_0 : i32, i32
  }
  func.func @transform_4(%arg0: i32) -> (i32, i32) {
    %c0_i32 = arith.constant 0 : i32
    %c0_i32_0 = arith.constant 0 : i32
    %c0_i32_1 = arith.constant 0 : i32
    return %c0_i32, %c0_i32_0 : i32, i32
  }
  func.func @transform_5(%arg0: i32) -> (i32, i32) {
    %c0_i32 = arith.constant 0 : i32
    %c0_i32_0 = arith.constant 0 : i32
    %c0_i32_1 = arith.constant 0 : i32
    return %c0_i32, %c0_i32_0 : i32, i32
  }
  func.func @transform_6(%arg0: i32) -> (i32, i32) {
    %c0_i32 = arith.constant 0 : i32
    %c0_i32_0 = arith.constant 0 : i32
    return %arg0, %c0_i32 : i32, i32
  }
}

</mosaic_0001>

<bundles_post_ra>
// kernel: tpu_custom_call.1
= control target key start
LH: loop header
LB: loop body
LE: loop exit
PB: predicated region body
PF: predicated region fallthrough
CT: control target
= control target key end

     0   :  { %11 = vsyncpa [#allocation3], 0  ;;  %s1153_s0 = inlined_call_operand.hbm [shape: bf16[8,8,32], index: 0, kind: input, shape index: {}]   ;;  %s1154_s1 = inlined_call_operand.hbm [shape: bf16[32,96], index: 1, kind: input, shape index: {}]   ;;  %s1155_s2 = inlined_call_operand.hbm [shape: bf16[32,32], index: 2, kind: input, shape index: {}]   ;;  %s1156_s3 = inlined_call_operand.hbm [shape: bf16[32,32], index: 3, kind: input, shape index: {}]   ;;  %s1157_s4 = inlined_call_operand.vmem [shape: f32[1,96], index: 4, kind: input, shape index: {}]   ;;  %s1158_s5 = inlined_call_operand.vmem [shape: f32[1,32], index: 5, kind: input, shape index: {}]   ;;  %s1159_s6 = inlined_call_operand.hbm [shape: f32[8,32], index: 6, kind: output, shape index: {}]  }
   0x1   :  { %12 = vsyncpa [#allocation6], 0 }
   0x2   :  { %13 = vsyncpa [#allocation9], 0 }
   0x3   :  { %14 = vsyncpa [#allocation4], 0  ;;  %s1001_s21 = smov [#allocation5]   ;;  %s1002_s23 = smov [#allocation2]  }
   0x4   :  { %s32_s22 = sshll.u32 %s1001_s21, 4  ;;  %s20_s24 = sshll.u32 %s1002_s23, 4  ;;  %s33_s22 = int_to_ptr.vmem [resolvable:$true] %s32_s22  ;;  %s21_s24 = int_to_ptr.vmem [resolvable:$true] %s20_s24 }
   0x5   :  { %s901_s25 = scalar_lea.vmem %s33_s22, 256  ;;  %p906_p1 = scmp.lt.s32.totalorder %s33_s22, %s33_s22 }
   0x6   :  { %p902_p0 = scmp.ne.s32.totalorder %s33_s22, %s901_s25  ;;  %p907_p2 = scmp.lt.s32.totalorder %s901_s25, %s901_s25 }
   0x8   :  { %p908_p3 = por %p907_p2, %p906_p1 }
   0xa   :  { %p909_p4 = pnand %p908_p3, %p902_p0 }
   0xc   :  { %912 = shalt.err (!%p909_p4)
}
   0xd   :  { %s1003_s26 = smov 64   ;;  %s1004_s27 = smov 4  }
   0xe   :  { %38 = dma.hbm_to_vmem [thread:$0]  %s1154_s1, 256, %s33_s22, [#allocation6], %s1003_s26, %s1003_s26, %s1004_s27  }
   0xf   :  { %s921_s30 = scalar_lea.vmem %s21_s24, 512  ;;  %p926_p6 = scmp.lt.s32.totalorder %s21_s24, %s21_s24 }
  0x10   :  { %p922_p5 = scmp.ne.s32.totalorder %s21_s24, %s921_s30  ;;  %p927_p7 = scmp.lt.s32.totalorder %s921_s30, %s921_s30 }
  0x12   :  { %p928_p8 = por %p927_p7, %p926_p6 }
  0x14   :  { %p929_p9 = pnand %p928_p8, %p922_p5 }
  0x16   :  { %932 = shalt.err (!%p929_p9)
}
  0x17   :  { %26 = dma.hbm_to_vmem [thread:$0]  %s1153_s0, 512, %s21_s24, [#allocation3], %s1003_s26, %s1003_s26, %s1004_s27  }
  0x18   :  { %s1005_s9 = smov [#allocation7]   ;;  %s1006_s11 = smov [#allocation8]  }
  0x19   :  { %s44_s10 = sshll.u32 %s1005_s9, 4  ;;  %s56_s12 = sshll.u32 %s1006_s11, 4  ;;  %s45_s10 = int_to_ptr.vmem [resolvable:$true] %s44_s10  ;;  %s57_s12 = int_to_ptr.vmem [resolvable:$true] %s56_s12 }
  0x1a   :  { %s941_s1 = scalar_lea.vmem %s45_s10, 256  ;;  %p946_p11 = scmp.lt.s32.totalorder %s45_s10, %s45_s10 }
  0x1b   :  { %p942_p10 = scmp.ne.s32.totalorder %s45_s10, %s941_s1  ;;  %p947_p12 = scmp.lt.s32.totalorder %s941_s1, %s941_s1 }
  0x1d   :  { %p948_p13 = por %p947_p12, %p946_p11 }
  0x1f   :  { %p949_p0 = pnand %p948_p13, %p942_p10 }
  0x21   :  { %952 = shalt.err (!%p949_p0)
}
  0x22   :  { %50 = dma.hbm_to_vmem [thread:$0]  %s1155_s2, 256, %s45_s10, [#allocation6], %s1003_s26, %s1003_s26, %s1004_s27  }
  0x23   :  { %s961_s0 = scalar_lea.vmem %s57_s12, 256  ;;  %p966_p2 = scmp.lt.s32.totalorder %s57_s12, %s57_s12 }
  0x24   :  { %p962_p1 = scmp.ne.s32.totalorder %s57_s12, %s961_s0  ;;  %p967_p3 = scmp.lt.s32.totalorder %s961_s0, %s961_s0 }
  0x26   :  { %p968_p4 = por %p967_p3, %p966_p2 }
  0x28   :  { %p969_p5 = pnand %p968_p4, %p962_p1 }
  0x2a   :  { %972 = shalt.err (!%p969_p5)
}
  0x2b   :  { %62 = dma.hbm_to_vmem [thread:$0]  %s1156_s3, 256, %s57_s12, [#allocation9], %s1003_s26, %s1003_s26, %s1004_s27  }
  0x2c   :  { %993 = dma.done.wait [#allocation3], 512  }
  0x2d   :  { %994 = vsyncadd [#allocation3], 4294966784 }
  0x2e   :  { %995 = dma.done.wait [#allocation6], 512  }
  0x2f   :  { %996 = vsyncadd [#allocation6], 4294966784 }
  0x30   :  { %997 = dma.done.wait [#allocation9], 256  }
  0x31   :  { %998 = vsyncadd [#allocation9], 4294967040  ;;  %v851_v0 = vld [vmem:[#allocation5 + $0x8] sm:$0xff]   ;;  %v852_v1 = vld [vmem:[#allocation5] sm:$0xff]   ;;  %vm131_vm0 = vcmask 261120   ;;  %s1007_s17 = smov 96   ;;  %v209_v25 = vlaneseq }
  0x32   :  { %809 = vmatprep.subr.bf16.mxu0 %v851_v0  ;;  %v853_v2 = vld [vmem:[#allocation2] sm:$0xff]   ;;  %v854_v3 = vld [vmem:[#allocation2 + $0x8] sm:$0xff]   ;;  %v855_v4 = vld [vmem:[#allocation2 + $0x10] sm:$0xff]   ;;  %v1008_v57 = vmov 0.0   ;;  %vm1009_vm1 = vmmov 0   ;;  %vm677_vm2 = vcmask 1041409  }
  0x33   :  { %810 = vmatpush3.bf16.msra.mxu0 %v851_v0  ;;  %813 = vmatprep.mubr.msk.bf16.mxu0 %vm131_vm0, %v853_v2  ;;  %v856_v5 = vld [vmem:[#allocation2 + $0x18] sm:$0xff]   ;;  %v857_v6 = vld [vmem:[#allocation8 + $0x8] sm:$0xff]   ;;  %v858_v7 = vld [vmem:[#allocation8] sm:$0xff]   ;;  %v210_v26 = vshrl.u32 %v209_v25, 7  ;;  %vm679_vm3 = vcmask 1042434   ;;  %vm681_vm4 = vcmask 1043459  }
  0x34   :  { %811 = vmatprep.subr.bf16.mxu0 %v852_v1  ;;  %821 = vmatprep.subr.bf16.mxu1 %v857_v6  ;;  %v765_v8 = vld [vmem:[%s1157_s4] ss:$0 sm:$0xff]  ;;  %v859_v56 = vld [vmem:[#allocation7 + $0x8] sm:$0xff]   ;;  %v860_v58 = vld [vmem:[#allocation7] sm:$0xff]   ;;  %vm683_vm5 = vcmask 1044484   ;;  %vm685_vm6 = vcmask 1045509  }
  0x35   :  { %822 = vmatpush3.bf16.msra.mxu1 %v857_v6  ;;  %v211_v27 = vsub.s32 0, %v210_v26  ;;  %vm687_vm7 = vcmask 1046534   ;;  %vm689_vm8 = vcmask 1047559   ;;  %s1010_s19 = smov [#allocation10]  }
  0x36   :  { %823 = vmatprep.subr.bf16.mxu1 %v858_v7  ;;  %s754_s20 = sshll.u32 %s1010_s19, 4  ;;  %s755_s20 = int_to_ptr.vmem [resolvable:$true] %s754_s20 }
  0x37   :  { %812 = vmatpush3.bf16.msra.mxu0 %v852_v1  ;;  %s973_s21 = scalar_lea.vmem %s755_s20, 128  ;;  %p978_p7 = scmp.lt.s32.totalorder %s755_s20, %s755_s20 }
  0x38   :  { %833 = vmatprep.subr.bf16.mxu0 %v1008_v57  ;;  %p974_p6 = scmp.ne.s32.totalorder %s755_s20, %s973_s21  ;;  %p979_p8 = scmp.lt.s32.totalorder %s973_s21, %s973_s21 }
  0x39   :  { %824 = vmatpush3.bf16.msra.mxu1 %v858_v7 }
  0x3a   :  { %814 = vmatmul.mubr.msk.bf16.vlgmr.msra.gmra.mxu0 %vm131_vm0, %v854_v3  ;;  %p980_p9 = por %p979_p8, %p978_p7 }
  0x3b   :  { %817 = vmatprep.mubr.msk.bf16.mxu0 %vm131_vm0, %v855_v4  ;;  %834 = vmatpush3.bf16.msra.mxu0 %v859_v56 }
  0x3c   :  { %835 = vmatprep.subr.bf16.mxu0 %v1008_v57  ;;  %p981_p10 = pnand %p980_p9, %p974_p6 }
  0x3f   :  { %836 = vmatpush3.bf16.msra.mxu0 %v860_v58 }
  0x42   :  { %818 = vmatmul.mubr.msk.bf16.gmra.mxu0 %vm131_vm0, %v856_v5 }
  0x43   :  { %837 = vmatprep.mubr.msk.bf16.mxu0 %vm1009_vm1, %v1008_v57 }
  0xfa   :  { %v815_v9 = vpop.f32.mrf.mxu0 }
  0xfb   :  { %v187_v10 = vadd.f32 %v815_v9, %v765_v8 }
  0xfc   :  { %v178_v11 = vpop.f32.mrf.mxu0 }
  0xfd   :  { %v179_v12 = vadd.f32 %v765_v8, %v178_v11  ;;  %253 = vrot.lane.b32.xlu1 %v187_v10, %s1007_s17  ;;  %v220_v30 = vrot.slane %v187_v10, %v211_v27 }
  0xfe   :  { %v816_v13 = vpop.f32.mrf.mxu0 }
  0xff   :  { %v190_v14 = vadd.f32 %v816_v13, %v765_v8  ;;  %249 = vrot.lane.b32.xlu0 %v179_v12, %s1007_s17  ;;  %v212_v34 = vrot.slane %v179_v12, %v211_v27 }
 0x100   :  { %v181_v15 = vpop.f32.mrf.mxu0 }
 0x101   :  { %v182_v16 = vadd.f32 %v765_v8, %v181_v15  ;;  %255 = vrot.lane.b32.xlu1 %v190_v14, %s1007_s17  ;;  %v224_v31 = vrot.slane %v190_v14, %v211_v27 }
 0x102   :  { %v819_v17 = vpop.f32.mrf.mxu0 }
 0x103   :  { %251 = vrot.lane.b32.xlu0 %v182_v16, %s1007_s17  ;;  %v203_v22 = vadd.f32 %v819_v17, %v765_v8  ;;  %v216_v36 = vrot.slane %v182_v16, %v211_v27 }
 0x104   :  { %v194_v18 = vpop.f32.mrf.mxu0 }
 0x105   :  { %v195_v19 = vadd.f32 %v765_v8, %v194_v18  ;;  %v236_v50 = vrot.slane %v203_v22, %v211_v27 }
 0x106   :  { %v820_v20 = vpop.f32.mrf.mxu0 }
 0x107   :  { %257 = vrot.lane.b32.xlu0 %v195_v19, %s1007_s17  ;;  %v206_v24 = vadd.f32 %v820_v20, %v765_v8  ;;  %v228_v43 = vrot.slane %v195_v19, %v211_v27 }
 0x108   :  { %v197_v21 = vpop.f32.mrf.mxu0 }
 0x109   :  { %v198_v23 = vadd.f32 %v765_v8, %v197_v21  ;;  %v240_v51 = vrot.slane %v206_v24, %v211_v27 }
 0x10b   :  { %259 = vrot.lane.b32.xlu1 %v198_v23, %s1007_s17  ;;  %261 = vrot.lane.b32.xlu0 %v203_v22, %s1007_s17  ;;  %v232_v44 = vrot.slane %v198_v23, %v211_v27 }
 0x10f   :  { %263 = vrot.lane.b32.xlu1 %v206_v24, %s1007_s17  ;;  %554 = vrot.lane.b32.xlu0 %v179_v12, %s1003_s26 }
 0x113   :  { %556 = vrot.lane.b32.xlu1 %v182_v16, %s1003_s26  ;;  %558 = vrot.lane.b32.xlu0 %v187_v10, %s1003_s26 }
 0x117   :  { %560 = vrot.lane.b32.xlu1 %v190_v14, %s1003_s26  ;;  %562 = vrot.lane.b32.xlu0 %v195_v19, %s1003_s26 }
 0x11b   :  { %564 = vrot.lane.b32.xlu1 %v198_v23, %s1003_s26  ;;  %566 = vrot.lane.b32.xlu0 %v203_v22, %s1003_s26 }
 0x11f   :  { %568 = vrot.lane.b32.xlu1 %v206_v24, %s1003_s26 }
 0x16f   :  { %v254_v28 = vpop.permute.xlu1 %253 }
 0x170   :  { %v275_v33 = vmul.f32 %v254_v28, %v220_v30 }
 0x171   :  { %v250_v29 = vpop.permute.xlu0 %249 }
 0x172   :  { %v273_v38 = vmul.f32 %v250_v29, %v212_v34 }
 0x173   :  { %v256_v32 = vpop.permute.xlu1 %255 }
 0x174   :  { %v276_v35 = vmul.f32 %v256_v32, %v224_v31 }
 0x175   :  { %v252_v37 = vpop.permute.xlu0 %251 }
 0x176   :  { %v791_v39 = vpack.c.bf16 %v276_v35, %v275_v33  ;;  %v274_v40 = vmul.f32 %v252_v37, %v216_v36 }
 0x178   :  { %v790_v41 = vpack.c.bf16 %v274_v40, %v273_v38 }
 0x179   :  { %v258_v42 = vpop.permute.xlu0 %257 }
 0x17a   :  { %825 = vmatprep.mubr.msk.bf16.mxu1 %vm131_vm0, %v790_v41  ;;  %v277_v46 = vmul.f32 %v258_v42, %v228_v43 }
 0x17b   :  { %826 = vmatmul.mubr.msk.bf16.vlgmr.msra.gmra.mxu1 %vm131_vm0, %v791_v39 }
 0x17d   :  { %v260_v45 = vpop.permute.xlu1 %259  ;;  %v262_v48 = vpop.permute.xlu0 %261 }
 0x17e   :  { %v278_v47 = vmul.f32 %v260_v45, %v232_v44  ;;  %v279_v53 = vmul.f32 %v262_v48, %v236_v50 }
 0x180   :  { %v792_v49 = vpack.c.bf16 %v278_v47, %v277_v46 }
 0x181   :  { %v264_v52 = vpop.permute.xlu1 %263 }
 0x182   :  { %v280_v54 = vmul.f32 %v264_v52, %v240_v51  ;;  %829 = vmatprep.mubr.msk.bf16.mxu1 %vm131_vm0, %v792_v49 }
 0x184   :  { %v793_v55 = vpack.c.bf16 %v280_v54, %v279_v53 }
 0x186   :  { %830 = vmatmul.mubr.msk.bf16.gmra.mxu1 %vm131_vm0, %v793_v55 }
 0x23b   :  { %v827_v59 = vpop.f32.mrf.mxu1 }
 0x23c   :  { %v416_v60 = vsel %vm131_vm0, %v827_v59, -inf }
 0x23d   :  { %v417_v61 = vrot.slane %v416_v60, 4  ;;  %v371_v62 = vpop.f32.mrf.mxu1 }
 0x23e   :  { %v402_v63 = vsel %vm131_vm0, %v371_v62, -inf }
 0x23f   :  { %v418_v0 = vmax.f32 %v416_v60, %v417_v61  ;;  %v403_v1 = vrot.slane %v402_v63, 4  ;;  %v828_v2 = vpop.f32.mrf.mxu1 }
 0x240   :  { %v423_v3 = vsel %vm131_vm0, %v828_v2, -inf }
 0x241   :  { %v419_v4 = vrot.slane %v418_v0, 2  ;;  %v404_v5 = vmax.f32 %v402_v63, %v403_v1  ;;  %v424_v6 = vrot.slane %v423_v3, 4  ;;  %v374_v7 = vpop.f32.mrf.mxu1 }
 0x242   :  { %v409_v8 = vsel %vm131_vm0, %v374_v7, -inf }
 0x243   :  { %v420_v9 = vmax.f32 %v418_v0, %v419_v4  ;;  %v405_v10 = vrot.slane %v404_v5, 2  ;;  %v425_v11 = vmax.f32 %v423_v3, %v424_v6  ;;  %v410_v12 = vrot.slane %v409_v8, 4 }
 0x245   :  { %v421_v13 = vrot.slane %v420_v9, 1  ;;  %v406_v14 = vmax.f32 %v404_v5, %v405_v10  ;;  %v426_v15 = vrot.slane %v425_v11, 2  ;;  %v411_v16 = vmax.f32 %v409_v8, %v410_v12 }
 0x246   :  { %v831_v17 = vpop.f32.mrf.mxu1 }
 0x247   :  { %v422_v18 = vmax.f32 %v420_v9, %v421_v13  ;;  %v407_v19 = vrot.slane %v406_v14, 1  ;;  %v427_v20 = vmax.f32 %v425_v11, %v426_v15  ;;  %v412_v21 = vrot.slane %v411_v16, 2 }
 0x248   :  { %v444_v22 = vsel %vm131_vm0, %v831_v17, -inf  ;;  %v387_v23 = vpop.f32.mrf.mxu1 }
 0x249   :  { %v460_v24 = vsub.f32 %v827_v59, %v422_v18  ;;  %v408_v25 = vmax.f32 %v406_v14, %v407_v19  ;;  %v428_v26 = vrot.slane %v427_v20, 1  ;;  %v413_v27 = vmax.f32 %v411_v16, %v412_v21 }
 0x24a   :  { %v445_v28 = vrot.slane %v444_v22, 4  ;;  %v430_v29 = vsel %vm131_vm0, %v387_v23, -inf  ;;  %v832_v30 = vpop.f32.mrf.mxu1 }
 0x24b   :  { %v470_v31 = vmul.f32 1.442695, %v460_v24  ;;  %v458_v32 = vsub.f32 %v371_v62, %v408_v25  ;;  %v429_v33 = vmax.f32 %v427_v20, %v428_v26  ;;  %v414_v34 = vrot.slane %v413_v27, 1 }
 0x24c   :  { %v446_v35 = vmax.f32 %v444_v22, %v445_v28  ;;  %v431_v36 = vrot.slane %v430_v29, 4  ;;  %v451_v37 = vsel %vm131_vm0, %v832_v30, -inf  ;;  %v390_v38 = vpop.f32.mrf.mxu1 }
 0x24d   :  { %861 = vpow2.f32 %v470_v31  ;;  %v466_v39 = vmul.f32 1.442695, %v458_v32  ;;  %v461_v40 = vsub.f32 %v828_v2, %v429_v33  ;;  %v415_v41 = vmax.f32 %v413_v27, %v414_v34 }
 0x24e   :  { %v447_v42 = vrot.slane %v446_v35, 2  ;;  %v432_v43 = vmax.f32 %v430_v29, %v431_v36  ;;  %v452_v44 = vrot.slane %v451_v37, 4  ;;  %v437_v45 = vsel %vm131_vm0, %v390_v38, -inf }
 0x24f   :  { %863 = vpow2.f32 %v466_v39  ;;  %v472_v46 = vmul.f32 1.442695, %v461_v40  ;;  %v459_v47 = vsub.f32 %v374_v7, %v415_v41  ;;  %v438_v48 = vrot.slane %v437_v45, 4 }
 0x250   :  { %v448_v49 = vmax.f32 %v446_v35, %v447_v42  ;;  %v433_v50 = vrot.slane %v432_v43, 2  ;;  %v453_v51 = vmax.f32 %v451_v37, %v452_v44 }
 0x251   :  { %865 = vpow2.f32 %v472_v46  ;;  %v468_v52 = vmul.f32 1.442695, %v459_v47  ;;  %v439_v53 = vmax.f32 %v437_v45, %v438_v48 }
 0x252   :  { %v449_v54 = vrot.slane %v448_v49, 1  ;;  %v434_v55 = vmax.f32 %v432_v43, %v433_v50  ;;  %v454_v56 = vrot.slane %v453_v51, 2 }
 0x253   :  { %867 = vpow2.f32 %v468_v52  ;;  %v440_v57 = vrot.slane %v439_v53, 2 }
 0x254   :  { %v450_v58 = vmax.f32 %v448_v49, %v449_v54  ;;  %v435_v59 = vrot.slane %v434_v55, 1  ;;  %v455_v60 = vmax.f32 %v453_v51, %v454_v56 }
 0x255   :  { %v441_v61 = vmax.f32 %v439_v53, %v440_v57 }
 0x256   :  { %v464_v62 = vsub.f32 %v831_v17, %v450_v58  ;;  %v436_v63 = vmax.f32 %v434_v55, %v435_v59  ;;  %v456_v0 = vrot.slane %v455_v60, 1 }
 0x257   :  { %v442_v1 = vrot.slane %v441_v61, 1 }
 0x258   :  { %v478_v2 = vmul.f32 1.442695, %v464_v62  ;;  %v462_v3 = vsub.f32 %v387_v23, %v436_v63  ;;  %v457_v4 = vmax.f32 %v455_v60, %v456_v0 }
 0x259   :  { %v443_v5 = vmax.f32 %v441_v61, %v442_v1  ;;  %v555_v61 = vpop.permute.xlu0 %554 }
 0x25a   :  { %v1097_v6 = vpop.eup %861  ;;  %869 = vpow2.f32 %v478_v2  ;;  %v474_v7 = vmul.f32 1.442695, %v462_v3  ;;  %v465_v8 = vsub.f32 %v832_v30, %v457_v4 }
 0x25b   :  { %v496_v9 = vsel %vm131_vm0, %v1097_v6, 0.0  ;;  %v463_v10 = vsub.f32 %v390_v38, %v443_v5 }
 0x25c   :  { %v1101_v11 = vpop.eup %863  ;;  %v497_v12 = vrot.slane %v496_v9, 4  ;;  %871 = vpow2.f32 %v474_v7  ;;  %v480_v13 = vmul.f32 1.442695, %v465_v8  ;;  %v557_v8 = vpop.permute.xlu1 %556 }
 0x25d   :  { %v482_v14 = vsel %vm131_vm0, %v1101_v11, 0.0  ;;  %v476_v15 = vmul.f32 1.442695, %v463_v10 }
 0x25e   :  { %v1105_v16 = vpop.eup %865  ;;  %v498_v17 = vadd.f32 %v497_v12, %v496_v9  ;;  %v483_v18 = vrot.slane %v482_v14, 4  ;;  %873 = vpow2.f32 %v480_v13 }
 0x25f   :  { %v503_v19 = vsel %vm131_vm0, %v1105_v16, 0.0  ;;  %875 = vpow2.f32 %v476_v15  ;;  %v559_v15 = vpop.permute.xlu0 %558 }
 0x260   :  { %v1109_v20 = vpop.eup %867  ;;  %v499_v21 = vrot.slane %v498_v17, 2  ;;  %v484_v22 = vadd.f32 %v483_v18, %v482_v14  ;;  %v504_v23 = vrot.slane %v503_v19, 4 }
 0x261   :  { %v489_v24 = vsel %vm131_vm0, %v1109_v20, 0.0 }
 0x262   :  { %v500_v25 = vadd.f32 %v499_v21, %v498_v17  ;;  %v485_v26 = vrot.slane %v484_v22, 2  ;;  %v505_v27 = vadd.f32 %v504_v23, %v503_v19  ;;  %v490_v28 = vrot.slane %v489_v24, 4 }
 0x264   :  { %v501_v29 = vrot.slane %v500_v25, 1  ;;  %v486_v30 = vadd.f32 %v485_v26, %v484_v22  ;;  %v506_v31 = vrot.slane %v505_v27, 2  ;;  %v491_v32 = vadd.f32 %v490_v28, %v489_v24 }
 0x266   :  { %v502_v33 = vadd.f32 %v501_v29, %v500_v25  ;;  %v487_v34 = vrot.slane %v486_v30, 1  ;;  %v507_v35 = vadd.f32 %v506_v31, %v505_v27  ;;  %v492_v36 = vrot.slane %v491_v32, 2  ;;  %v561_v27 = vpop.permute.xlu1 %560 }
 0x267   :  { %v1113_v37 = vpop.eup %869 }
 0x268   :  { %877 = vrcp.f32 %v502_v33  ;;  %v488_v38 = vadd.f32 %v487_v34, %v486_v30  ;;  %v508_v39 = vrot.slane %v507_v35, 1  ;;  %v493_v40 = vadd.f32 %v492_v36, %v491_v32  ;;  %v563_v34 = vpop.permute.xlu0 %562 }
 0x269   :  { %v1115_v41 = vpop.eup %871  ;;  %v524_v42 = vsel %vm131_vm0, %v1113_v37, 0.0 }
 0x26a   :  { %879 = vrcp.f32 %v488_v38  ;;  %v509_v43 = vadd.f32 %v508_v39, %v507_v35  ;;  %v494_v44 = vrot.slane %v493_v40, 1  ;;  %v525_v45 = vrot.slane %v524_v42, 4 }
 0x26b   :  { %v1119_v46 = vpop.eup %873  ;;  %v510_v47 = vsel %vm131_vm0, %v1115_v41, 0.0 }
 0x26c   :  { %v1123_v48 = vpop.eup %875  ;;  %881 = vrcp.f32 %v509_v43  ;;  %v495_v49 = vadd.f32 %v494_v44, %v493_v40  ;;  %v526_v50 = vadd.f32 %v525_v45, %v524_v42  ;;  %v511_v51 = vrot.slane %v510_v47, 4  ;;  %v565_v44 = vpop.permute.xlu1 %564 }
 0x26d   :  { %v531_v52 = vsel %vm131_vm0, %v1119_v46, 0.0  ;;  %v517_v53 = vsel %vm131_vm0, %v1123_v48, 0.0 }
 0x26e   :  { %883 = vrcp.f32 %v495_v49  ;;  %v527_v54 = vrot.slane %v526_v50, 2  ;;  %v512_v55 = vadd.f32 %v511_v51, %v510_v47  ;;  %v532_v56 = vrot.slane %v531_v52, 4 }
 0x26f   :  { %v518_v57 = vrot.slane %v517_v53, 4 }
 0x270   :  { %v528_v58 = vadd.f32 %v527_v54, %v526_v50  ;;  %v513_v59 = vrot.slane %v512_v55, 2  ;;  %v533_v60 = vadd.f32 %v532_v56, %v531_v52  ;;  %v567_v50 = vpop.permute.xlu0 %566 }
 0x271   :  { %v519_v62 = vadd.f32 %v518_v57, %v517_v53 }
 0x272   :  { %v529_v63 = vrot.slane %v528_v58, 1  ;;  %v514_v0 = vadd.f32 %v513_v59, %v512_v55  ;;  %v534_v1 = vrot.slane %v533_v60, 2 }
 0x273   :  { %v520_v2 = vrot.slane %v519_v62, 2 }
 0x274   :  { %v530_v3 = vadd.f32 %v529_v63, %v528_v58  ;;  %v515_v4 = vrot.slane %v514_v0, 1  ;;  %v535_v5 = vadd.f32 %v534_v1, %v533_v60  ;;  %v569_v63 = vpop.permute.xlu1 %568 }
 0x275   :  { %v878_v7 = vpop.eup %877  ;;  %v521_v9 = vadd.f32 %v520_v2, %v519_v62 }
 0x276   :  { %v548_v10 = vmul.f32 %v878_v7, %v1097_v6  ;;  %885 = vrcp.f32 %v530_v3  ;;  %v516_v12 = vadd.f32 %v515_v4, %v514_v0  ;;  %v536_v13 = vrot.slane %v535_v5, 1 }
 0x277   :  { %v880_v14 = vpop.eup %879  ;;  %v522_v17 = vrot.slane %v521_v9, 1 }
 0x278   :  { %v580_v18 = vmul.f32 %v559_v15, %v548_v10  ;;  %v546_v19 = vmul.f32 %v880_v14, %v1101_v11  ;;  %887 = vrcp.f32 %v516_v12  ;;  %v537_v21 = vadd.f32 %v536_v13, %v535_v5 }
 0x279   :  { %v882_v22 = vpop.eup %881  ;;  %v523_v23 = vadd.f32 %v522_v17, %v521_v9 }
 0x27a   :  { %v600_v24 = vsel %vm131_vm0, %v580_v18, 0.0  ;;  %v578_v25 = vmul.f32 %v555_v61, %v546_v19  ;;  %v549_v26 = vmul.f32 %v882_v22, %v1105_v16  ;;  %889 = vrcp.f32 %v537_v21 }
 0x27b   :  { %v884_v6 = vpop.eup %883  ;;  %891 = vrcp.f32 %v523_v23  ;;  %v601_v28 = vrot.slane %v600_v24, 4 }
 0x27c   :  { %v586_v29 = vsel %vm131_vm0, %v578_v25, 0.0  ;;  %v581_v30 = vmul.f32 %v561_v27, %v549_v26  ;;  %v547_v31 = vmul.f32 %v884_v6, %v1109_v20 }
 0x27d   :  { %v587_v11 = vrot.slane %v586_v29, 4  ;;  %v602_v38 = vadd.f32 %v601_v28, %v600_v24 }
 0x27e   :  { %v607_v32 = vsel %vm131_vm0, %v581_v30, 0.0  ;;  %v579_v33 = vmul.f32 %v557_v8, %v547_v31 }
 0x27f   :  { %v588_v35 = vadd.f32 %v587_v11, %v586_v29  ;;  %v608_v36 = vrot.slane %v607_v32, 4  ;;  %v603_v47 = vrot.slane %v602_v38, 2 }
 0x280   :  { %v593_v16 = vsel %vm131_vm0, %v579_v33, 0.0 }
 0x281   :  { %v589_v39 = vrot.slane %v588_v35, 2  ;;  %v609_v40 = vadd.f32 %v608_v36, %v607_v32  ;;  %v594_v42 = vrot.slane %v593_v16, 4  ;;  %v604_v59 = vadd.f32 %v603_v47, %v602_v38 }
 0x283   :  { %v886_v43 = vpop.eup %885  ;;  %v595_v45 = vadd.f32 %v594_v42, %v593_v16  ;;  %v590_v51 = vadd.f32 %v589_v39, %v588_v35  ;;  %v610_v52 = vrot.slane %v609_v40, 2  ;;  %v605_v8 = vrot.slane %v604_v59, 1 }
 0x284   :  { %v552_v49 = vmul.f32 %v886_v43, %v1113_v37 }
 0x285   :  { %v888_v20 = vpop.eup %887  ;;  %v596_v53 = vrot.slane %v595_v45, 2  ;;  %v591_v0 = vrot.slane %v590_v51, 1  ;;  %v611_v37 = vadd.f32 %v610_v52, %v609_v40  ;;  %v606_v24 = vadd.f32 %v605_v8, %v604_v59 }
 0x286   :  { %v584_v54 = vmul.f32 %v567_v50, %v552_v49  ;;  %v550_v55 = vmul.f32 %v888_v20, %v1115_v41 }
 0x287   :  { %v890_v56 = vpop.eup %889  ;;  %v597_v57 = vadd.f32 %v596_v53, %v595_v45  ;;  %v592_v13 = vadd.f32 %v591_v0, %v590_v51  ;;  %v612_v15 = vrot.slane %v611_v37, 1  ;;  %v644_v33 = vpack.c.bf16 %v606_v24, %v606_v24 }
 0x288   :  { %v892_v58 = vpop.eup %891  ;;  %v628_v60 = vsel %vm131_vm0, %v584_v54, 0.0  ;;  %v582_v61 = vmul.f32 %v563_v34, %v550_v55  ;;  %v553_v62 = vmul.f32 %v890_v56, %v1119_v46 }
 0x289   :  { %v598_v1 = vrot.slane %v597_v57, 1  ;;  %v629_v2 = vrot.slane %v628_v60, 4  ;;  %v551_v5 = vmul.f32 %v892_v58, %v1123_v48  ;;  %v642_v25 = vpack.c.bf16 %v592_v13, %v592_v13 }
 0x28a   :  { %v614_v3 = vsel %vm131_vm0, %v582_v61, 0.0  ;;  %v585_v4 = vmul.f32 %v569_v63, %v553_v62  ;;  %v613_v28 = vadd.f32 %v612_v15, %v611_v37  ;;  %v671_v45 = vunpack.c.l.b16 %v644_v33  ;;  %v786_v63 = vld [vmem:[%s1158_s5] ss:$0 sm:$0xff] }
 0x28b   :  { %v599_v41 = vadd.f32 %v598_v1, %v597_v57  ;;  %v615_v7 = vrot.slane %v614_v3, 4  ;;  %v630_v9 = vadd.f32 %v629_v2, %v628_v60  ;;  %v583_v12 = vmul.f32 %v565_v44, %v551_v5 }
 0x28c   :  { %v635_v10 = vsel %vm131_vm0, %v585_v4, 0.0  ;;  %v669_v34 = vunpack.c.l.b16 %v642_v25  ;;  %v645_v16 = vpack.c.bf16 %v613_v28, %v613_v28 }
 0x28d   :  { %v616_v14 = vadd.f32 %v615_v7, %v614_v3  ;;  %v636_v46 = vrot.slane %v635_v10, 4  ;;  %v631_v17 = vrot.slane %v630_v9, 2  ;;  %v621_v18 = vsel %vm131_vm0, %v583_v12, 0.0 }
 0x28e   :  { %v643_v19 = vpack.c.bf16 %v599_v41, %v599_v41  ;;  %v622_v23 = vrot.slane %v621_v18, 4  ;;  %v672_v51 = vunpack.c.l.b16 %v645_v16 }
 0x28f   :  { %v617_v21 = vrot.slane %v616_v14, 2  ;;  %v637_v22 = vadd.f32 %v636_v46, %v635_v10  ;;  %v632_v48 = vadd.f32 %v631_v17, %v630_v9 }
 0x290   :  { %v623_v27 = vadd.f32 %v622_v23, %v621_v18  ;;  %v670_v30 = vunpack.c.l.b16 %v643_v19 }
 0x291   :  { %v618_v26 = vadd.f32 %v617_v21, %v616_v14  ;;  %v638_v6 = vrot.slane %v637_v22, 2  ;;  %v633_v29 = vrot.slane %v632_v48, 1 }
 0x292   :  { %v624_v32 = vrot.slane %v623_v27, 2  ;;  %v678_v44 = vsel %vm677_vm2, %v670_v30, %v669_v34 }
 0x293   :  { %v619_v31 = vrot.slane %v618_v26, 1  ;;  %v639_v11 = vadd.f32 %v638_v6, %v637_v22  ;;  %v634_v39 = vadd.f32 %v633_v29, %v632_v48  ;;  %v680_v50 = vsel %vm679_vm3, %v671_v45, %v678_v44 }
 0x294   :  { %v625_v36 = vadd.f32 %v624_v32, %v623_v27  ;;  %v682_v55 = vsel %vm681_vm4, %v672_v51, %v680_v50 }
 0x295   :  { %v620_v35 = vadd.f32 %v619_v31, %v618_v26  ;;  %v640_v38 = vrot.slane %v639_v11, 1  ;;  %v648_v20 = vpack.c.bf16 %v634_v39, %v634_v39 }
 0x296   :  { %v626_v42 = vrot.slane %v625_v36, 1 }
 0x297   :  { %v646_v40 = vpack.c.bf16 %v620_v35, %v620_v35  ;;  %v641_v43 = vadd.f32 %v640_v38, %v639_v11  ;;  %v675_v56 = vunpack.c.l.b16 %v648_v20 }
 0x298   :  { %v627_v47 = vadd.f32 %v626_v42, %v625_v36 }
 0x299   :  { %v673_v49 = vunpack.c.l.b16 %v646_v40  ;;  %v649_v53 = vpack.c.bf16 %v641_v43, %v641_v43 }
 0x29a   :  { %v647_v52 = vpack.c.bf16 %v627_v47, %v627_v47 }
 0x29b   :  { %v684_v57 = vsel %vm683_vm5, %v673_v49, %v682_v55  ;;  %v676_v58 = vunpack.c.l.b16 %v649_v53 }
 0x29c   :  { %v674_v54 = vunpack.c.l.b16 %v647_v52 }
 0x29e   :  { %v686_v59 = vsel %vm685_vm6, %v674_v54, %v684_v57 }
 0x29f   :  { %v688_v60 = vsel %vm687_vm7, %v675_v56, %v686_v59 }
 0x2a0   :  { %v690_v61 = vsel %vm689_vm8, %v676_v58, %v688_v60 }
 0x2a1   :  { %v691_v62 = vpack.c.b16 %v690_v61, %v690_v61 }
 0x2a3   :  { %838 = vmatmul.mubr.msk.bf16.vlgmr.msra.gmra.mxu0 %vm131_vm0, %v691_v62 }
 0x363   :  { %v741_v0 = vpop.f32.mrf.mxu0 }
 0x364   :  { %v742_v37 = vadd.f32 %v786_v63, %v741_v0 }
 0x365   :  { %v839_v1 = vpop.f32.mrf.mxu0 }
 0x366   :  { %747 = vst.msk [vmem:[#allocation10] sm:$0xff] %vm131_vm0, %v742_v37 }
 0x367   :  { %v744_v2 = vpop.f32.mrf.mxu0 }
 0x368   :  { %984 = shalt.err (!%p981_p10)
}
 0x369   :  { %757 = dma.vmem_to_hbm [thread:$0]  %s755_s20, 128, %s1159_s6, [#allocation4]   ;;  %v840_v3 = vpop.f32.mrf.mxu0 }
 0x36a   :  { %999 = dma.done.wait [#allocation4], 128  }
 0x36b   :  { %1000 = vsyncadd [#allocation4], 4294967168 }
 0x36c   :  { %761 = vsyncpa [#allocation3], 1 }
 0x36d   :  { %762 = vsyncpa [#allocation6], 1 }
 0x36e   :  { %763 = vsyncpa [#allocation9], 1 }
 0x36f   :  { %764 = vsyncpa [#allocation4], 1 }

</bundles_post_ra>
